<compile_context>
chip_gen: v5e
topology: v5e:2x2
jax: 0.10.0
libtpu: 0.0.40
codegen_flags: <defaults>
</compile_context>

<pallas_src>
import jax
import jax.numpy as jnp
import numpy as np
from jax import lax
from jax.experimental import pallas as pl
from jax.experimental.pallas import tpu as pltpu

# ---- problem configuration (small, consistent with the module) -------------
B = 2            # batch
T = 8            # num_tokens (sequence length)
C = 16           # embedding_dim (conv in_channels)
F = 16           # num_filters  (conv out_channels)
G = 4            # groups
NGRAMS = (1, 2, 3, 4)
DOUT = 32        # output_dim (projection exists since 4*F = 64 != 32)

KMAX = max(NGRAMS)
NGF = F * len(NGRAMS)       # pooled feature width (4*F = 64)
KC = KMAX * C               # im2col patch width   (4*C = 64)


# ---- Pallas kernel: one conv matmul + fused epilogue + projection -----------
def encoder_kernel(patch_ref, wconv_ref, bconv_ref, mask_ref, wproj_ref,
                   bproj_ref, out_ref):
    """
    patch_ref: (bb*T, KMAX*C) bf16   im2col patches
    wconv_ref: (KMAX*C, NG*F) bf16   fused block-diagonal grouped-conv weight
    bconv_ref: (1, NG*F)      f32    concatenated conv biases
    mask_ref:  (T, NG*F)      f32    0 at valid (t, ngram) positions, -1e30 at invalid
    wproj_ref: (NG*F, DOUT)   f32    projection weight (pre-transposed)
    bproj_ref: (1, DOUT)      f32    projection bias
    out_ref:   (bb, DOUT)     f32
    """
    t_len, ngf = mask_ref.shape
    bb = patch_ref.shape[0] // t_len

    # Single MXU matmul covering all ngram sizes / positions / taps.
    acts = jnp.dot(patch_ref[...], wconv_ref[...],
                   preferred_element_type=jnp.float32)            # (bb*T, NG*F) f32

    # Fused f32 epilogue: bias + ReLU, mask invalid time positions, max over time.
    acts = acts.reshape(bb, t_len, ngf)                           # tile-aligned split
    acts = jnp.maximum(acts + bconv_ref[...][None], 0.0) + mask_ref[...][None]
    pooled = jnp.max(acts, axis=1)                                # (bb, NG*F)

    # Projection (kept f32 on all generations; tiny matmul).
    out = jnp.dot(pooled, wproj_ref[...], preferred_element_type=jnp.float32)
    out_ref[...] = out + bproj_ref[...]


# ---- wrapper ----------------------------------------------------------------
def encoder_forward(tokens, w_fused, b_fused, neg_mask, proj_w_t, proj_b,
                    *, batch_block=None):
    """tokens: (B, T, C) f32. Returns (B, DOUT) f32."""
    b_, t_, c_ = tokens.shape
    kc = KMAX * c_
    ngf, dout = proj_w_t.shape

    # im2col in the wrapper (pure layout plumbing; removes all in-kernel middle-axis
    # slicing / XLU relayout): row (b, t) = [x_t | ... | x_{t+KMAX-1}], zero padded.
    pieces = [jnp.pad(tokens[:, k:, :], ((0, 0), (0, k), (0, 0)))
              for k in range(KMAX)]
    patches = jnp.concatenate(pieces, axis=-1).reshape(b_ * t_, kc)

    # bf16 matmul operands (MXU-native on v6e/v7x); accumulation + epilogue stay f32 (v5e-safe).
    patches = patches.astype(jnp.bfloat16)
    w_fused = w_fused.astype(jnp.bfloat16)

    bb = batch_block or b_
    assert b_ % bb == 0
    grid = (b_ // bb,)

    return pl.pallas_call(
        encoder_kernel,
        out_shape=jax.ShapeDtypeStruct((b_, dout), jnp.float32),
        grid_spec=pltpu.PrefetchScalarGridSpec(
            num_scalar_prefetch=0,
            grid=grid,
            in_specs=[
                pl.BlockSpec((bb * t_, kc), lambda i: (i, 0)),
                pl.BlockSpec((kc, ngf), lambda i: (0, 0)),
                pl.BlockSpec((1, ngf), lambda i: (0, 0)),
                pl.BlockSpec((t_, ngf), lambda i: (0, 0)),
                pl.BlockSpec((ngf, dout), lambda i: (0, 0)),
                pl.BlockSpec((1, dout), lambda i: (0, 0)),
            ],
            out_specs=pl.BlockSpec((bb, dout), lambda i: (i, 0)),
        ),
        # Batch-block axis is parallel: with production batch sizes pass batch_block < B so
        # the grid shards across v7x's two TensorCores; at B=2 it is a single block.
        compiler_params=pltpu.CompilerParams(
            dimension_semantics=("parallel",)),
    )(patches, w_fused, b_fused, neg_mask, proj_w_t, proj_b.reshape(1, -1))


# ---- parameter construction (deterministic, synthetic) ----------------------
def make_grouped_conv_params(key, c_in, c_out, groups, k_size):
    """Torch-layout grouped Conv1d params: weight (F, C/G, K), bias (F,)."""
    c_pg = c_in // groups
    kw, kb = jax.random.split(key)
    w = jax.random.uniform(kw, (c_out, c_pg, k_size), minval=-0.1, maxval=0.1,
                           dtype=jnp.float32)
    bias = jax.random.uniform(kb, (c_out,), minval=-0.1, maxval=0.1, dtype=jnp.float32)
    return w, bias


def dense_from_grouped(w, c_in, groups, k_size):
    """(F, C/G, K) torch grouped-conv weight -> dense block-diagonal (K*C, F)."""
    c_out = w.shape[0]
    c_pg, f_pg = c_in // groups, c_out // groups
    dense = np.zeros((k_size, c_in, c_out), np.float32)
    w_np = np.asarray(w)
    for g in range(groups):
        block = np.transpose(w_np[g * f_pg:(g + 1) * f_pg], (2, 1, 0))  # (K, C/G, F/G)
        dense[:, g * c_pg:(g + 1) * c_pg, g * f_pg:(g + 1) * f_pg] = block
    return dense.reshape(k_size * c_in, c_out)


def build_fused_conv(conv_params_torch, c_in, groups):
    """Fuse all ngram convs into one (KMAX*C, NG*F) weight + (1, NG*F) bias."""
    w_fused = np.zeros((KMAX * c_in, NGF), np.float32)
    b_fused = np.zeros((1, NGF), np.float32)
    col = 0
    for (w, bias), k_size in zip(conv_params_torch, NGRAMS):
        f = w.shape[0]
        w_fused[: k_size * c_in, col:col + f] = dense_from_grouped(w, c_in, groups, k_size)
        b_fused[0, col:col + f] = np.asarray(bias)
        col += f
    return jnp.asarray(w_fused), jnp.asarray(b_fused)


def build_time_mask(t_len, num_filters):
    """(T, NG*F) additive mask: 0 where position t is valid for the ngram, -1e30 otherwise."""
    mask = np.zeros((t_len, num_filters * len(NGRAMS)), np.float32)
    for i, k in enumerate(NGRAMS):
        invalid = np.arange(t_len) > (t_len - k)          # valid positions: t <= T - K
        mask[invalid, i * num_filters:(i + 1) * num_filters] = -1e30
    return jnp.asarray(mask)


# ---- pure-JAX reference (f32, mirrors the PyTorch forward) -------------------
def reference_forward(tokens, conv_params_torch, proj_w_t, proj_b):
    x_ncw = jnp.transpose(tokens, (0, 2, 1))                      # (B, C, T)
    feats = []
    for w, bias in conv_params_torch:                             # w: (F, C/G, K)
        y = lax.conv_general_dilated(
            x_ncw, w, window_strides=(1,), padding="VALID",
            dimension_numbers=("NCH", "OIH", "NCH"),
            feature_group_count=G)                                # (B, F, L)
        y = jnp.maximum(y + bias[None, :, None], 0.0)
        feats.append(jnp.max(y, axis=2))                          # (B, F)
    pooled = jnp.concatenate(feats, axis=1)                       # (B, 4F)
    return pooled @ proj_w_t + proj_b[None, :]                    # (B, DOUT)


if __name__ == "__main__":
    key = jax.random.PRNGKey(0)
    k_tok, k_proj_w, *k_convs = jax.random.split(key, 2 + len(NGRAMS))

    tokens = jax.random.normal(k_tok, (B, T, C), dtype=jnp.float32)

    conv_params_torch = []
    for kk, k_size in zip(k_convs, NGRAMS):
        conv_params_torch.append(make_grouped_conv_params(kk, C, F, G, k_size))

    w_fused, b_fused = build_fused_conv(conv_params_torch, C, G)
    neg_mask = build_time_mask(T, F)

    # Linear(4F, DOUT): weight stored pre-transposed as (4F, DOUT), bias 0 (init_weights).
    proj_w_t = 0.001 * jax.random.normal(k_proj_w, (NGF, DOUT), dtype=jnp.float32)
    proj_b = jnp.zeros((DOUT,), dtype=jnp.float32)

    out = encoder_forward(tokens, w_fused, b_fused, neg_mask, proj_w_t, proj_b)
    out = jax.block_until_ready(out)

    ref = reference_forward(tokens, conv_params_torch, proj_w_t, proj_b)
    # Tolerance loosened vs the pure-f32 reference because conv-matmul operands are bf16
    # (accumulation and epilogue are f32).
    np.testing.assert_allclose(np.asarray(out), np.asarray(ref), rtol=2e-2, atol=2e-3)

    print("KERNEL_OK")
</pallas_src>

<mosaic_0001>
module attributes {stable_mosaic.version = 11 : i64} {
  func.func @encoder_kernel(%arg0: i32, %arg1: memref<16x64xbf16, #tpu.memory_space<vmem>>, %arg2: memref<64x64xbf16, #tpu.memory_space<vmem>>, %arg3: memref<1x64xf32, #tpu.memory_space<vmem>>, %arg4: memref<8x64xf32, #tpu.memory_space<vmem>>, %arg5: memref<64x32xf32, #tpu.memory_space<vmem>>, %arg6: memref<1x32xf32, #tpu.memory_space<vmem>>, %arg7: memref<2x32xf32, #tpu.memory_space<vmem>>) attributes {dimension_semantics = [#tpu.dimension_semantics<parallel>], iteration_bounds = array<i64: 1>, scalar_prefetch = 0 : i64, scratch_operands = 0 : i64, tpu.core_type = #tpu.core_type<tc>, window_params = [{transform_indices = @transform_0, window_bounds = array<i64: 16, 64>}, {pipeline_mode = #tpu.pipeline_mode<synchronous>, transform_indices = @transform_1, window_bounds = array<i64: 64, 64>}, {pipeline_mode = #tpu.pipeline_mode<synchronous>, transform_indices = @transform_2, window_bounds = array<i64: 1, 64>}, {pipeline_mode = #tpu.pipeline_mode<synchronous>, transform_indices = @transform_3, window_bounds = array<i64: 8, 64>}, {pipeline_mode = #tpu.pipeline_mode<synchronous>, transform_indices = @transform_4, window_bounds = array<i64: 64, 32>}, {pipeline_mode = #tpu.pipeline_mode<synchronous>, transform_indices = @transform_5, window_bounds = array<i64: 1, 32>}, {transform_indices = @transform_6, window_bounds = array<i64: 2, 32>}]} {
    %c0 = arith.constant 0 : index
    %c0_0 = arith.constant 0 : index
    %0 = vector.load %arg1[%c0, %c0_0] : memref<16x64xbf16, #tpu.memory_space<vmem>>, vector<16x64xbf16>
    %c0_1 = arith.constant 0 : index
    %c0_2 = arith.constant 0 : index
    %1 = vector.load %arg2[%c0_1, %c0_2] : memref<64x64xbf16, #tpu.memory_space<vmem>>, vector<64x64xbf16>
    %cst = arith.constant dense<0.000000e+00> : vector<16x64xf32>
    %2 = tpu.matmul %0, %1, %cst {dimension_numbers = #tpu.dot_dimension_numbers<[1], [0], [0], [1], [0, 0, 1, 1], [], []>} : vector<16x64xbf16>, vector<64x64xbf16>, vector<16x64xf32> -> vector<16x64xf32>
    %3 = vector.shape_cast %2 : vector<16x64xf32> to vector<2x8x64xf32>
    %c0_3 = arith.constant 0 : index
    %c0_4 = arith.constant 0 : index
    %4 = vector.load %arg3[%c0_3, %c0_4] : memref<1x64xf32, #tpu.memory_space<vmem>>, vector<1x64xf32>
    %5 = vector.shape_cast %4 : vector<1x64xf32> to vector<1x1x64xf32>
    %6 = vector.broadcast %5 : vector<1x1x64xf32> to vector<2x8x64xf32>
    %7 = arith.addf %3, %6 : vector<2x8x64xf32>
    %cst_5 = arith.constant 0.000000e+00 : f32
    %8 = vector.broadcast %cst_5 : f32 to vector<2x8x64xf32>
    %9 = arith.maximumf %7, %8 : vector<2x8x64xf32>
    %c0_6 = arith.constant 0 : index
    %c0_7 = arith.constant 0 : index
    %10 = vector.load %arg4[%c0_6, %c0_7] : memref<8x64xf32, #tpu.memory_space<vmem>>, vector<8x64xf32>
    %11 = vector.shape_cast %10 : vector<8x64xf32> to vector<1x8x64xf32>
    %12 = vector.broadcast %11 : vector<1x8x64xf32> to vector<2x8x64xf32>
    %13 = arith.addf %9, %12 : vector<2x8x64xf32>
    %cst_8 = arith.constant dense<0xFF800000> : vector<2x64xf32>
    %14 = vector.multi_reduction <maximumf>, %13, %cst_8 [1] : vector<2x8x64xf32> to vector<2x64xf32>
    %c0_9 = arith.constant 0 : index
    %c0_10 = arith.constant 0 : index
    %15 = vector.load %arg5[%c0_9, %c0_10] : memref<64x32xf32, #tpu.memory_space<vmem>>, vector<64x32xf32>
    %cst_11 = arith.constant dense<0.000000e+00> : vector<2x32xf32>
    %16 = tpu.matmul %14, %15, %cst_11 {dimension_numbers = #tpu.dot_dimension_numbers<[1], [0], [0], [1], [0, 0, 1, 1], [], []>} : vector<2x64xf32>, vector<64x32xf32>, vector<2x32xf32> -> vector<2x32xf32>
    %c0_12 = arith.constant 0 : index
    %c0_13 = arith.constant 0 : index
    %17 = vector.load %arg6[%c0_12, %c0_13] : memref<1x32xf32, #tpu.memory_space<vmem>>, vector<1x32xf32>
    %18 = vector.broadcast %17 : vector<1x32xf32> to vector<2x32xf32>
    %19 = arith.addf %16, %18 : vector<2x32xf32>
    %c0_14 = arith.constant 0 : index
    %c0_15 = arith.constant 0 : index
    %20 = vector.load %arg7[%c0_14, %c0_15] : memref<2x32xf32, #tpu.memory_space<vmem>>, vector<2x32xf32>
    tpu.vector_store %arg7[%c0_14, %c0_15], %19 {strides = array<i32>} : memref<2x32xf32, #tpu.memory_space<vmem>>, vector<2x32xf32>,
    return
  }
  func.func @transform_0(%arg0: i32) -> (i32, i32) {
    %c0_i32 = arith.constant 0 : i32
    %c0_i32_0 = arith.constant 0 : i32
    return %arg0, %c0_i32 : i32, i32
  }
  func.func @transform_1(%arg0: i32) -> (i32, i32) {
    %c0_i32 = arith.constant 0 : i32
    %c0_i32_0 = arith.constant 0 : i32
    %c0_i32_1 = arith.constant 0 : i32
    return %c0_i32, %c0_i32_0 : i32, i32
  }
  func.func @transform_2(%arg0: i32) -> (i32, i32) {
    %c0_i32 = arith.constant 0 : i32
    %c0_i32_0 = arith.constant 0 : i32
    %c0_i32_1 = arith.constant 0 : i32
    return %c0_i32, %c0_i32_0 : i32, i32
  }
  func.func @transform_3(%arg0: i32) -> (i32, i32) {
    %c0_i32 = arith.constant 0 : i32
    %c0_i32_0 = arith.constant 0 : i32
    %c0_i32_1 = arith.constant 0 : i32
    return %c0_i32, %c0_i32_0 : i32, i32
  }
  func.func @transform_4(%arg0: i32) -> (i32, i32) {
    %c0_i32 = arith.constant 0 : i32
    %c0_i32_0 = arith.constant 0 : i32
    %c0_i32_1 = arith.constant 0 : i32
    return %c0_i32, %c0_i32_0 : i32, i32
  }
  func.func @transform_5(%arg0: i32) -> (i32, i32) {
    %c0_i32 = arith.constant 0 : i32
    %c0_i32_0 = arith.constant 0 : i32
    %c0_i32_1 = arith.constant 0 : i32
    return %c0_i32, %c0_i32_0 : i32, i32
  }
  func.func @transform_6(%arg0: i32) -> (i32, i32) {
    %c0_i32 = arith.constant 0 : i32
    %c0_i32_0 = arith.constant 0 : i32
    return %arg0, %c0_i32 : i32, i32
  }
}

</mosaic_0001>

<bundles_post_ra>
// kernel: tpu_custom_call.1
= control target key start
LH: loop header
LB: loop body
LE: loop exit
PB: predicated region body
PF: predicated region fallthrough
CT: control target
= control target key end

     0   :  { %s310_s0 = inlined_call_operand.vmem [shape: bf16[16,64], index: 0, kind: input, shape index: {}]   ;;  %s311_s1 = inlined_call_operand.vmem [shape: bf16[64,64], index: 1, kind: input, shape index: {}]   ;;  %s312_s2 = inlined_call_operand.vmem [shape: f32[1,64], index: 2, kind: input, shape index: {}]   ;;  %s313_s3 = inlined_call_operand.vmem [shape: f32[8,64], index: 3, kind: input, shape index: {}]   ;;  %s314_s4 = inlined_call_operand.vmem [shape: f32[64,32], index: 4, kind: input, shape index: {}]   ;;  %s315_s5 = inlined_call_operand.vmem [shape: f32[1,32], index: 5, kind: input, shape index: {}]   ;;  %s316_s6 = inlined_call_operand.hbm [shape: f32[2,32], index: 6, kind: output, shape index: {}]  }
   0x1   :  { %v189_v0 = vld [vmem:[%s311_s1 + $0x18] sm:$0xff]  ;;  %v188_v1 = vld [vmem:[%s311_s1 + $0x10] sm:$0xff] }
   0x2   :  { %72 = vmatpush.bf16.msra.mxu0 %v189_v0 }
   0x3   :  { %11 = vsyncpa [#allocation3], 0  ;;  %v187_v2 = vld [vmem:[%s311_s1 + $0x8] sm:$0xff]  ;;  %v186_v3 = vld [vmem:[%s311_s1] sm:$0xff]  ;;  %vm64_vm0 = vcmask 523264   ;;  %vm121_vm1 = vcmask 1041409  }
   0x4   :  { %v185_v4 = vld [vmem:[%s310_s0] sm:$0xff]  ;;  %v114_v5 = vld [vmem:[%s314_s4 + $0x38] sm:$0xff]  ;;  %v113_v6 = vld [vmem:[%s314_s4 + $0x30] sm:$0xff]  ;;  %s154_s28 = sshll.u32 %s316_s6, 4  ;;  %vm145_vm2 = vcmask 254976   ;;  %s155_s28 = int_to_ptr.hbm [resolvable:$true] %s154_s28 }
   0x5   :  { %133 = vmatpush.msra.mxu1 %v114_v5  ;;  %v112_v7 = vld [vmem:[%s314_s4 + $0x28] sm:$0xff]  ;;  %v111_v8 = vld [vmem:[%s314_s4 + $0x20] sm:$0xff]  ;;  %v110_v9 = vld [vmem:[%s314_s4 + $0x18] sm:$0xff] }
   0x6   :  { %73 = vmatpush.bf16.msra.mxu0 %v188_v1  ;;  %v109_v10 = vld [vmem:[%s314_s4 + $0x10] sm:$0xff]  ;;  %v108_v11 = vld [vmem:[%s314_s4 + $0x8] sm:$0xff]  ;;  %v107_v12 = vld [vmem:[%s314_s4] sm:$0xff]  ;;  %s219_s4 = smov [#allocation2]  }
   0x7   :  { %134 = vmatpush.msra.mxu1 %v113_v6  ;;  %v191_v13 = vld [vmem:[%s312_s2] ss:$0 sm:$0xff]  ;;  %s152_s25 = sshll.u32 %s219_s4, 4  ;;  %s153_s25 = int_to_ptr.vmem [resolvable:$true] %s152_s25 }
   0x8   :  { %v90_v16 = vld [vmem:[%s313_s3] sm:$0xff] }
   0x9   :  { %135 = vmatpush.msra.mxu1 %v112_v7  ;;  %v192_v38 = vld [vmem:[%s315_s5] ss:$0 sm:$0xff] }
   0xa   :  { %74 = vmatpush.bf16.msra.mxu0 %v187_v2 }
   0xb   :  { %136 = vmatpush.msra.mxu1 %v111_v8 }
   0xd   :  { %137 = vmatpush.msra.mxu1 %v110_v9 }
   0xe   :  { %75 = vmatpush.bf16.msra.mxu0 %v186_v3 }
   0xf   :  { %138 = vmatpush.msra.mxu1 %v109_v10 }
  0x11   :  { %183 = vmatmul.msk.bf16.vlgmr.msra.gmra.mxu0 %vm64_vm0, %v185_v4  ;;  %139 = vmatpush.msra.mxu1 %v108_v11 }
  0x13   :  { %140 = vmatpush.msra.mxu1 %v107_v12 }
  0x8e   :  { %v77_v14 = vpop.f32.mrf.mxu0 }
  0x8f   :  { %v86_v15 = vadd.f32 %v191_v13, %v77_v14 }
  0x91   :  { %v88_v17 = vmax.f32 %v86_v15, 0.0 }
  0x93   :  { %v91_v18 = vadd.f32 %v90_v16, %v88_v17 }
  0x95   :  { %v93_v19 = vsel %vm64_vm0, %v91_v18, -inf }
  0x96   :  { %v94_v20 = vrot.slane %v93_v19, 4  ;;  %v79_v21 = vpop.f32.mrf.mxu0 }
  0x97   :  { %v87_v22 = vadd.f32 %v191_v13, %v79_v21 }
  0x98   :  { %v95_v23 = vmax.f32 %v93_v19, %v94_v20 }
  0x99   :  { %v89_v24 = vmax.f32 %v87_v22, 0.0 }
  0x9a   :  { %v96_v26 = vrot.slane %v95_v23, 2 }
  0x9b   :  { %v92_v25 = vadd.f32 %v90_v16, %v89_v24 }
  0x9c   :  { %v97_v29 = vmax.f32 %v95_v23, %v96_v26 }
  0x9d   :  { %v100_v27 = vsel %vm64_vm0, %v92_v25, -inf }
  0x9e   :  { %v101_v28 = vrot.slane %v100_v27, 4  ;;  %v98_v33 = vrot.slane %v97_v29, 1 }
  0xa0   :  { %v102_v30 = vmax.f32 %v100_v27, %v101_v28  ;;  %v99_v35 = vmax.f32 %v97_v29, %v98_v33 }
  0xa2   :  { %v103_v31 = vrot.slane %v102_v30, 2 }
  0xa4   :  { %v104_v32 = vmax.f32 %v102_v30, %v103_v31 }
  0xa6   :  { %v105_v34 = vrot.slane %v104_v32, 1 }
  0xa8   :  { %v106_v36 = vmax.f32 %v104_v32, %v105_v34 }
  0xaa   :  { %v122_v37 = vsel %vm121_vm1, %v106_v36, %v99_v35 }
  0xab   :  { %184 = vmatmul.msk.f32.vlgmr.msra.gmra.mxu1 %vm64_vm0, %v122_v37 }
 0x128   :  { %v142_v39 = vpop.f32.mrf.mxu1 }
 0x129   :  { %v143_v40 = vadd.f32 %v192_v38, %v142_v39 }
 0x12b   :  { %146 = vst.msk [vmem:[#allocation2] sm:$0x3] %vm145_vm2, %v143_v40 }
 0x12c   :  { %157 = dma.vmem_to_hbm [thread:$0]  %s153_s25, 32, %s155_s28, [#allocation3]  }
 0x12d   :  { %217 = dma.done.wait [#allocation3], 32  }
 0x12e   :  { %218 = vsyncadd [#allocation3], 4294967264 }
 0x12f   :  { %162 = vsyncpa [#allocation3], 1 }

</bundles_post_ra>
